<compile_context>
chip_gen: v5e
topology: v5e:2x2
jax: 0.10.0
libtpu: 0.0.40
codegen_flags: <defaults>
</compile_context>

<pallas_src>
import jax
import jax.numpy as jnp
from jax.experimental import pallas as pl
from jax.experimental.pallas import tpu as pltpu

IN_DIM, H1, H2, OUT_DIM = 28 * 28, 128, 64, 10
DEFAULT_TB = 2048  # batch tile (rows per grid step); multiple of 16


def _round_up(x, m):
    return ((x + m - 1) // m) * m


def mlp_kernel(x_ref, w1_ref, b1_ref, w2_ref, b2_ref, w3_ref, b3_ref, o_ref):
    # x_ref: (TB, 784) float32 tile straight from HBM (single pass).
    # Cast to bf16 on the VPU (free under DMA slack) so the MXU gets native operands;
    # accumulation, bias-add and ReLU stay f32.
    x = x_ref[...].astype(jnp.bfloat16)

    # fc1 + ReLU  (bf16 x bf16 -> f32 accum on the MXU)
    h1 = jnp.dot(x, w1_ref[...], preferred_element_type=jnp.float32) + b1_ref[...]
    h1 = jnp.maximum(h1, 0.0)

    # fc2 + ReLU
    h2 = jnp.dot(h1.astype(jnp.bfloat16), w2_ref[...],
                 preferred_element_type=jnp.float32) + b2_ref[...]
    h2 = jnp.maximum(h2, 0.0)

    # fc3 (logits, no activation)
    logits = jnp.dot(h2.astype(jnp.bfloat16), w3_ref[...],
                     preferred_element_type=jnp.float32) + b3_ref[...]
    o_ref[...] = logits.astype(o_ref.dtype)


def multiclass_classifier_forward(x_nchw, params, *, tb=DEFAULT_TB):
    """Forward pass matching MultiClassClassifier.forward.

    x_nchw: (B, 1, 28, 28) float32 (NCHW MNIST input).
    params: dict of f32 weights stored as (in, out): w1 (784,128), b1 (128,),
            w2 (128,64), b2 (64,), w3 (64,10), b3 (10,).
    returns: (B, 10) float32 logits.
    """
    B = x_nchw.shape[0]
    x = x_nchw.reshape(B, IN_DIM).astype(jnp.float32)   # == x.view(-1, 784); NO bf16 pre-pass

    # Minimal sublane padding only (multiple of 8); no padding to a tile multiple.
    pad_b = _round_up(B, 8)
    if pad_b != B:
        x = jnp.pad(x, ((0, pad_b - B), (0, 0)))

    # Batch tile: big enough to amortize per-step overhead, multiple of 16, and capped
    # so the grid has at least ~2 steps (both v7x TensorCores get work).
    tb_eff = min(_round_up(tb, 16), max(_round_up(pl.cdiv(pad_b, 2), 8), 8))
    n_tiles = pl.cdiv(pad_b, tb_eff)                     # ragged last tile handled by Pallas

    w1 = params["w1"].astype(jnp.bfloat16)
    w2 = params["w2"].astype(jnp.bfloat16)
    w3 = params["w3"].astype(jnp.bfloat16)
    b1 = params["b1"].reshape(1, H1).astype(jnp.float32)
    b2 = params["b2"].reshape(1, H2).astype(jnp.float32)
    b3 = params["b3"].reshape(1, OUT_DIM).astype(jnp.float32)

    resident = lambda shape: pl.BlockSpec(shape, lambda i: (0, 0))  # VMEM-resident

    out = pl.pallas_call(
        mlp_kernel,
        out_shape=jax.ShapeDtypeStruct((pad_b, OUT_DIM), jnp.float32),
        grid=(n_tiles,),
        in_specs=[
            pl.BlockSpec((tb_eff, IN_DIM), lambda i: (i, 0)),   # x: walks the batch (f32)
            resident((IN_DIM, H1)),
            resident((1, H1)),
            resident((H1, H2)),
            resident((1, H2)),
            resident((H2, OUT_DIM)),
            resident((1, OUT_DIM)),
        ],
        out_specs=pl.BlockSpec((tb_eff, OUT_DIM), lambda i: (i, 0)),
        compiler_params=pltpu.CompilerParams(
            dimension_semantics=("parallel",),   # shard batch tiles across TCs (v7x)
            vmem_limit_bytes=32 << 20,           # fits f32 x tile double-buffered + scratch
        ),
    )(x, w1, b1, w2, b2, w3, b3)

    return out if pad_b == B else out[:B]


def init_params(key):
    """Deterministic init mimicking PyTorch nn.Linear default (uniform +/- 1/sqrt(fan_in))."""
    def linear(k, fan_in, fan_out):
        kw, kb = jax.random.split(k)
        bound = 1.0 / jnp.sqrt(fan_in)
        w = jax.random.uniform(kw, (fan_in, fan_out), jnp.float32, -bound, bound)
        b = jax.random.uniform(kb, (fan_out,), jnp.float32, -bound, bound)
        return w, b

    k1, k2, k3 = jax.random.split(key, 3)
    w1, b1 = linear(k1, IN_DIM, H1)
    w2, b2 = linear(k2, H1, H2)
    w3, b3 = linear(k3, H2, OUT_DIM)
    return {"w1": w1, "b1": b1, "w2": w2, "b2": b2, "w3": w3, "b3": b3}


def reference_forward_f32(x_nchw, params):
    """Plain-JAX f32 reference identical in semantics to the PyTorch module."""
    x = x_nchw.reshape(x_nchw.shape[0], IN_DIM).astype(jnp.float32)
    h1 = jnp.maximum(x @ params["w1"] + params["b1"], 0.0)
    h2 = jnp.maximum(h1 @ params["w2"] + params["b2"], 0.0)
    return h2 @ params["w3"] + params["b3"]


def reference_forward_bf16(x_nchw, params):
    """Plain-JAX reference using the same bf16-operand / f32-accumulate recipe as the kernel."""
    x = x_nchw.reshape(x_nchw.shape[0], IN_DIM).astype(jnp.bfloat16)
    w1 = params["w1"].astype(jnp.bfloat16)
    w2 = params["w2"].astype(jnp.bfloat16)
    w3 = params["w3"].astype(jnp.bfloat16)
    h1 = jnp.dot(x, w1, preferred_element_type=jnp.float32) + params["b1"]
    h1 = jnp.maximum(h1, 0.0)
    h2 = jnp.dot(h1.astype(jnp.bfloat16), w2, preferred_element_type=jnp.float32) + params["b2"]
    h2 = jnp.maximum(h2, 0.0)
    return jnp.dot(h2.astype(jnp.bfloat16), w3, preferred_element_type=jnp.float32) + params["b3"]


if __name__ == "__main__":
    key = jax.random.PRNGKey(0)
    kp, kx = jax.random.split(key)
    params = init_params(kp)

    # Small MNIST-like batch: (B=2, C=1, H=28, W=28), NCHW like PyTorch.
    x = jax.random.normal(kx, (2, 1, 28, 28), dtype=jnp.float32)

    logits = multiclass_classifier_forward(x, params)
    jax.block_until_ready(logits)
    assert logits.shape == (2, 10)

    # Tight check vs. a reference using the identical bf16-operand recipe.
    ref_bf16 = reference_forward_bf16(x, params)
    assert jnp.allclose(logits, ref_bf16, atol=5e-3, rtol=5e-3), "mismatch vs bf16 reference"

    # Loose sanity check vs. the exact f32 semantics of the PyTorch module.
    ref_f32 = reference_forward_f32(x, params)
    assert jnp.allclose(logits, ref_f32, atol=1e-1, rtol=1e-1), "mismatch vs f32 reference"

    # Also exercise a larger, non-tile-multiple batch to hit the ragged-last-tile path.
    xb = jax.random.normal(kx, (1000, 1, 28, 28), dtype=jnp.float32)
    logits_b = multiclass_classifier_forward(xb, params)
    jax.block_until_ready(logits_b)
    assert logits_b.shape == (1000, 10)
    assert jnp.allclose(logits_b, reference_forward_bf16(xb, params), atol=5e-3, rtol=5e-3), \
        "mismatch vs bf16 reference (large batch)"

    print("KERNEL_OK")
</pallas_src>

<mosaic_0001>
module attributes {stable_mosaic.version = 11 : i64} {
  func.func @mlp_kernel(%arg0: i32, %arg1: memref<8x784xf32, #tpu.memory_space<vmem>>, %arg2: memref<784x128xbf16, #tpu.memory_space<vmem>>, %arg3: memref<1x128xf32, #tpu.memory_space<vmem>>, %arg4: memref<128x64xbf16, #tpu.memory_space<vmem>>, %arg5: memref<1x64xf32, #tpu.memory_space<vmem>>, %arg6: memref<64x10xbf16, #tpu.memory_space<vmem>>, %arg7: memref<1x10xf32, #tpu.memory_space<vmem>>, %arg8: memref<8x10xf32, #tpu.memory_space<vmem>>) attributes {dimension_semantics = [#tpu.dimension_semantics<parallel>], iteration_bounds = array<i64: 1>, scalar_prefetch = 0 : i64, scratch_operands = 0 : i64, tpu.core_type = #tpu.core_type<tc>, window_params = [{transform_indices = @transform_0, window_bounds = array<i64: 8, 784>}, {pipeline_mode = #tpu.pipeline_mode<synchronous>, transform_indices = @transform_1, window_bounds = array<i64: 784, 128>}, {pipeline_mode = #tpu.pipeline_mode<synchronous>, transform_indices = @transform_2, window_bounds = array<i64: 1, 128>}, {pipeline_mode = #tpu.pipeline_mode<synchronous>, transform_indices = @transform_3, window_bounds = array<i64: 128, 64>}, {pipeline_mode = #tpu.pipeline_mode<synchronous>, transform_indices = @transform_4, window_bounds = array<i64: 1, 64>}, {pipeline_mode = #tpu.pipeline_mode<synchronous>, transform_indices = @transform_5, window_bounds = array<i64: 64, 10>}, {pipeline_mode = #tpu.pipeline_mode<synchronous>, transform_indices = @transform_6, window_bounds = array<i64: 1, 10>}, {transform_indices = @transform_7, window_bounds = array<i64: 8, 10>}]} {
    %c0 = arith.constant 0 : index
    %c0_0 = arith.constant 0 : index
    %0 = vector.load %arg1[%c0, %c0_0] : memref<8x784xf32, #tpu.memory_space<vmem>>, vector<8x784xf32>
    %1 = arith.truncf %0 : vector<8x784xf32> to vector<8x784xbf16>
    %c0_1 = arith.constant 0 : index
    %c0_2 = arith.constant 0 : index
    %2 = vector.load %arg2[%c0_1, %c0_2] : memref<784x128xbf16, #tpu.memory_space<vmem>>, vector<784x128xbf16>
    %cst = arith.constant dense<0.000000e+00> : vector<8x128xf32>
    %3 = tpu.matmul %1, %2, %cst {dimension_numbers = #tpu.dot_dimension_numbers<[1], [0], [0], [1], [0, 0, 1, 1], [], []>} : vector<8x784xbf16>, vector<784x128xbf16>, vector<8x128xf32> -> vector<8x128xf32>
    %c0_3 = arith.constant 0 : index
    %c0_4 = arith.constant 0 : index
    %4 = vector.load %arg3[%c0_3, %c0_4] : memref<1x128xf32, #tpu.memory_space<vmem>>, vector<1x128xf32>
    %5 = vector.broadcast %4 : vector<1x128xf32> to vector<8x128xf32>
    %6 = arith.addf %3, %5 : vector<8x128xf32>
    %cst_5 = arith.constant 0.000000e+00 : f32
    %7 = vector.broadcast %cst_5 : f32 to vector<8x128xf32>
    %8 = arith.maximumf %6, %7 : vector<8x128xf32>
    %9 = arith.truncf %8 : vector<8x128xf32> to vector<8x128xbf16>
    %c0_6 = arith.constant 0 : index
    %c0_7 = arith.constant 0 : index
    %10 = vector.load %arg4[%c0_6, %c0_7] : memref<128x64xbf16, #tpu.memory_space<vmem>>, vector<128x64xbf16>
    %cst_8 = arith.constant dense<0.000000e+00> : vector<8x64xf32>
    %11 = tpu.matmul %9, %10, %cst_8 {dimension_numbers = #tpu.dot_dimension_numbers<[1], [0], [0], [1], [0, 0, 1, 1], [], []>} : vector<8x128xbf16>, vector<128x64xbf16>, vector<8x64xf32> -> vector<8x64xf32>
    %c0_9 = arith.constant 0 : index
    %c0_10 = arith.constant 0 : index
    %12 = vector.load %arg5[%c0_9, %c0_10] : memref<1x64xf32, #tpu.memory_space<vmem>>, vector<1x64xf32>
    %13 = vector.broadcast %12 : vector<1x64xf32> to vector<8x64xf32>
    %14 = arith.addf %11, %13 : vector<8x64xf32>
    %cst_11 = arith.constant 0.000000e+00 : f32
    %15 = vector.broadcast %cst_11 : f32 to vector<8x64xf32>
    %16 = arith.maximumf %14, %15 : vector<8x64xf32>
    %17 = arith.truncf %16 : vector<8x64xf32> to vector<8x64xbf16>
    %c0_12 = arith.constant 0 : index
    %c0_13 = arith.constant 0 : index
    %18 = vector.load %arg6[%c0_12, %c0_13] : memref<64x10xbf16, #tpu.memory_space<vmem>>, vector<64x10xbf16>
    %cst_14 = arith.constant dense<0.000000e+00> : vector<8x10xf32>
    %19 = tpu.matmul %17, %18, %cst_14 {dimension_numbers = #tpu.dot_dimension_numbers<[1], [0], [0], [1], [0, 0, 1, 1], [], []>} : vector<8x64xbf16>, vector<64x10xbf16>, vector<8x10xf32> -> vector<8x10xf32>
    %c0_15 = arith.constant 0 : index
    %c0_16 = arith.constant 0 : index
    %20 = vector.load %arg7[%c0_15, %c0_16] : memref<1x10xf32, #tpu.memory_space<vmem>>, vector<1x10xf32>
    %21 = vector.broadcast %20 : vector<1x10xf32> to vector<8x10xf32>
    %22 = arith.addf %19, %21 : vector<8x10xf32>
    %c0_17 = arith.constant 0 : index
    %c0_18 = arith.constant 0 : index
    %23 = vector.load %arg8[%c0_17, %c0_18] : memref<8x10xf32, #tpu.memory_space<vmem>>, vector<8x10xf32>
    tpu.vector_store %arg8[%c0_17, %c0_18], %22 {strides = array<i32>} : memref<8x10xf32, #tpu.memory_space<vmem>>, vector<8x10xf32>,
    return
  }
  func.func @transform_0(%arg0: i32) -> (i32, i32) {
    %c0_i32 = arith.constant 0 : i32
    %c0_i32_0 = arith.constant 0 : i32
    return %arg0, %c0_i32 : i32, i32
  }
  func.func @transform_1(%arg0: i32) -> (i32, i32) {
    %c0_i32 = arith.constant 0 : i32
    %c0_i32_0 = arith.constant 0 : i32
    %c0_i32_1 = arith.constant 0 : i32
    return %c0_i32, %c0_i32_0 : i32, i32
  }
  func.func @transform_2(%arg0: i32) -> (i32, i32) {
    %c0_i32 = arith.constant 0 : i32
    %c0_i32_0 = arith.constant 0 : i32
    %c0_i32_1 = arith.constant 0 : i32
    return %c0_i32, %c0_i32_0 : i32, i32
  }
  func.func @transform_3(%arg0: i32) -> (i32, i32) {
    %c0_i32 = arith.constant 0 : i32
    %c0_i32_0 = arith.constant 0 : i32
    %c0_i32_1 = arith.constant 0 : i32
    return %c0_i32, %c0_i32_0 : i32, i32
  }
  func.func @transform_4(%arg0: i32) -> (i32, i32) {
    %c0_i32 = arith.constant 0 : i32
    %c0_i32_0 = arith.constant 0 : i32
    %c0_i32_1 = arith.constant 0 : i32
    return %c0_i32, %c0_i32_0 : i32, i32
  }
  func.func @transform_5(%arg0: i32) -> (i32, i32) {
    %c0_i32 = arith.constant 0 : i32
    %c0_i32_0 = arith.constant 0 : i32
    %c0_i32_1 = arith.constant 0 : i32
    return %c0_i32, %c0_i32_0 : i32, i32
  }
  func.func @transform_6(%arg0: i32) -> (i32, i32) {
    %c0_i32 = arith.constant 0 : i32
    %c0_i32_0 = arith.constant 0 : i32
    %c0_i32_1 = arith.constant 0 : i32
    return %c0_i32, %c0_i32_0 : i32, i32
  }
  func.func @transform_7(%arg0: i32) -> (i32, i32) {
    %c0_i32 = arith.constant 0 : i32
    %c0_i32_0 = arith.constant 0 : i32
    return %arg0, %c0_i32 : i32, i32
  }
}

</mosaic_0001>

<bundles_post_ra>
// kernel: tpu_custom_call.1
= control target key start
LH: loop header
LB: loop body
LE: loop exit
PB: predicated region body
PF: predicated region fallthrough
CT: control target
= control target key end

     0   :  { %12 = vsyncpa [#allocation3], 0  ;;  %s1188_s0 = inlined_call_operand.vmem [shape: f32[8,784], index: 0, kind: input, shape index: {}]   ;;  %s1189_s1 = inlined_call_operand.hbm [shape: bf16[784,128], index: 1, kind: input, shape index: {}]   ;;  %s1190_s2 = inlined_call_operand.vmem [shape: f32[1,128], index: 2, kind: input, shape index: {}]   ;;  %s1191_s3 = inlined_call_operand.vmem [shape: bf16[128,64], index: 3, kind: input, shape index: {}]   ;;  %s1192_s4 = inlined_call_operand.vmem [shape: f32[1,64], index: 4, kind: input, shape index: {}]   ;;  %s1193_s5 = inlined_call_operand.vmem [shape: bf16[64,10], index: 5, kind: input, shape index: {}]   ;;  %s1194_s6 = inlined_call_operand.vmem [shape: f32[1,10], index: 6, kind: input, shape index: {}]   ;;  %s1195_s7 = inlined_call_operand.hbm [shape: f32[8,10], index: 7, kind: output, shape index: {}]  }
   0x1   :  { %13 = vsyncpa [#allocation4], 0  ;;  %s20_s26 = sshll.u32 %s1189_s1, 4  ;;  %s1072_s27 = smov [#allocation2]   ;;  %s21_s26 = int_to_ptr.hbm [resolvable:$true] %s20_s26 }
   0x2   :  { %s22_s28 = sshll.u32 %s1072_s27, 4  ;;  %s1073_s29 = smov 64   ;;  %s23_s28 = int_to_ptr.vmem [resolvable:$true] %s22_s28 }
   0x3   :  { %s1074_s30 = smov 4  }
   0x4   :  { %28 = dma.hbm_to_vmem [thread:$0]  %s21_s26, 6272, %s23_s28, [#allocation3], %s1073_s29, %s1073_s29, %s1074_s30  }
   0x5   :  { %1068 = dma.done.wait [#allocation3], 6272  }
   0x6   :  { %1069 = vsyncadd [#allocation3], 4294961024  ;;  %v959_v0 = vld [vmem:[#allocation2 + $0x38] sm:$0xff]  ;;  %v958_v3 = vld [vmem:[#allocation2 + $0x30] sm:$0xff]  ;;  %vm454_vm0 = vcmask 130048   ;;  %vm670_vm1 = vcmask 523264  }
   0x7   :  { %v967_v1 = vld [vmem:[#allocation2 + $0x78] sm:$0xff]  ;;  %458 = vmatpush.bf16.msra.mxu0 %v959_v0  ;;  %v966_v4 = vld [vmem:[#allocation2 + $0x70] sm:$0xff]  ;;  %v957_v8 = vld [vmem:[#allocation2 + $0x28] sm:$0xff]  ;;  %s1075_s24 = smov [#allocation5]   ;;  %vm687_vm2 = vcmask 80896  }
   0x8   :  { %v975_v2 = vld [vmem:[#allocation2 + $0xb8] sm:$0xff]  ;;  %471 = vmatpush.bf16.msra.mxu1 %v967_v1  ;;  %v974_v5 = vld [vmem:[#allocation2 + $0xb0] sm:$0xff]  ;;  %v965_v9 = vld [vmem:[#allocation2 + $0x68] sm:$0xff]  ;;  %s694_s25 = sshll.u32 %s1075_s24, 4  ;;  %s695_s25 = int_to_ptr.vmem [resolvable:$true] %s694_s25 }
   0x9   :  { %484 = vmatpush.bf16.msra.mxu2 %v975_v2  ;;  %v983_v6 = vld [vmem:[#allocation2 + $0xf8] sm:$0xff]  ;;  %v982_v7 = vld [vmem:[#allocation2 + $0xf0] sm:$0xff]  ;;  %v973_v10 = vld [vmem:[#allocation2 + $0xa8] sm:$0xff] }
   0xa   :  { %497 = vmatpush.bf16.msra.mxu3 %v983_v6  ;;  %v981_v11 = vld [vmem:[#allocation2 + $0xe8] sm:$0xff]  ;;  %v956_v12 = vld [vmem:[#allocation2 + $0x20] sm:$0xff]  ;;  %v955_v16 = vld [vmem:[#allocation2 + $0x18] sm:$0xff] }
   0xb   :  { %459 = vmatpush.bf16.msra.mxu0 %v958_v3  ;;  %v964_v13 = vld [vmem:[#allocation2 + $0x60] sm:$0xff]  ;;  %v963_v17 = vld [vmem:[#allocation2 + $0x58] sm:$0xff]  ;;  %v954_v20 = vld [vmem:[#allocation2 + $0x10] sm:$0xff] }
   0xc   :  { %472 = vmatpush.bf16.msra.mxu1 %v966_v4  ;;  %v972_v14 = vld [vmem:[#allocation2 + $0xa0] sm:$0xff]  ;;  %v971_v18 = vld [vmem:[#allocation2 + $0x98] sm:$0xff]  ;;  %v962_v21 = vld [vmem:[#allocation2 + $0x50] sm:$0xff] }
   0xd   :  { %485 = vmatpush.bf16.msra.mxu2 %v974_v5  ;;  %v980_v15 = vld [vmem:[#allocation2 + $0xe0] sm:$0xff]  ;;  %v979_v19 = vld [vmem:[#allocation2 + $0xd8] sm:$0xff]  ;;  %v970_v22 = vld [vmem:[#allocation2 + $0x90] sm:$0xff] }
   0xe   :  { %498 = vmatpush.bf16.msra.mxu3 %v982_v7  ;;  %v978_v23 = vld [vmem:[#allocation2 + $0xd0] sm:$0xff]  ;;  %v953_v24 = vld [vmem:[#allocation2 + $0x8] sm:$0xff]  ;;  %v952_v27 = vld [vmem:[#allocation2] sm:$0xff] }
   0xf   :  { %460 = vmatpush.bf16.msra.mxu0 %v957_v8  ;;  %v961_v25 = vld [vmem:[#allocation2 + $0x48] sm:$0xff]  ;;  %v960_v29 = vld [vmem:[#allocation2 + $0x40] sm:$0xff]  ;;  %v991_v32 = vld [vmem:[#allocation2 + $0x138] sm:$0xff] }
  0x10   :  { %473 = vmatpush.bf16.msra.mxu1 %v965_v9  ;;  %v969_v26 = vld [vmem:[#allocation2 + $0x88] sm:$0xff]  ;;  %v44_v30 = vld [vmem:[%s1188_s0] sm:$0xff]  ;;  %v999_v33 = vld [vmem:[#allocation2 + $0x178] sm:$0xff] }
  0x11   :  { %486 = vmatpush.bf16.msra.mxu2 %v973_v10  ;;  %v977_v28 = vld [vmem:[#allocation2 + $0xc8] sm:$0xff]  ;;  %v968_v34 = vld [vmem:[#allocation2 + $0x80] sm:$0xff]  ;;  %v46_v35 = vld [vmem:[%s1188_s0 + $0x10] sm:$0xff]  ;;  %v51_v36 = vpack.c.bf16 %v44_v30, %v44_v30 }
  0x12   :  { %499 = vmatpush.bf16.msra.mxu3 %v981_v11  ;;  %v45_v31 = vld [vmem:[%s1188_s0 + $0x8] sm:$0xff]  ;;  %v976_v38 = vld [vmem:[#allocation2 + $0xc0] sm:$0xff]  ;;  %v47_v40 = vld [vmem:[%s1188_s0 + $0x18] sm:$0xff]  ;;  %v53_v43 = vpack.c.bf16 %v46_v35, %v46_v35 }
  0x13   :  { %461 = vmatpush.bf16.msra.mxu0 %v956_v12  ;;  %v52_v37 = vpack.c.bf16 %v45_v31, %v45_v31  ;;  %v1000_v39 = vld [vmem:[#allocation2 + $0x180] sm:$0xff]  ;;  %v990_v41 = vld [vmem:[#allocation2 + $0x130] sm:$0xff]  ;;  %v54_v44 = vpack.c.bf16 %v47_v40, %v47_v40  ;;  %v989_v45 = vld [vmem:[#allocation2 + $0x128] sm:$0xff] }
  0x14   :  { %474 = vmatpush.bf16.msra.mxu1 %v964_v13  ;;  %v998_v42 = vld [vmem:[#allocation2 + $0x170] sm:$0xff]  ;;  %v997_v46 = vld [vmem:[#allocation2 + $0x168] sm:$0xff]  ;;  %v988_v47 = vld [vmem:[#allocation2 + $0x120] sm:$0xff] }
  0x15   :  { %487 = vmatpush.bf16.msra.mxu2 %v972_v14  ;;  %v996_v48 = vld [vmem:[#allocation2 + $0x160] sm:$0xff]  ;;  %v987_v49 = vld [vmem:[#allocation2 + $0x118] sm:$0xff]  ;;  %v50_v51 = vld [vmem:[%s1188_s0 + $0x30] sm:$0xff] }
  0x16   :  { %500 = vmatpush.bf16.msra.mxu3 %v980_v15  ;;  %v995_v50 = vld [vmem:[#allocation2 + $0x158] sm:$0xff]  ;;  %v986_v52 = vld [vmem:[#allocation2 + $0x110] sm:$0xff]  ;;  %v57_v54 = vpack.c.bf16 %v50_v51, %v50_v51  ;;  %v985_v55 = vld [vmem:[#allocation2 + $0x108] sm:$0xff] }
  0x17   :  { %462 = vmatpush.bf16.msra.mxu0 %v955_v16  ;;  %v994_v53 = vld [vmem:[#allocation2 + $0x150] sm:$0xff]  ;;  %v993_v56 = vld [vmem:[#allocation2 + $0x148] sm:$0xff]  ;;  %v984_v57 = vld [vmem:[#allocation2 + $0x100] sm:$0xff] }
  0x18   :  { %475 = vmatpush.bf16.msra.mxu1 %v963_v17  ;;  %v992_v58 = vld [vmem:[#allocation2 + $0x140] sm:$0xff]  ;;  %v49_v60 = vld [vmem:[%s1188_s0 + $0x28] sm:$0xff]  ;;  %v1008_v63 = vld [vmem:[%s1191_s3 + $0x38] sm:$0xff] }
  0x19   :  { %488 = vmatpush.bf16.msra.mxu2 %v971_v18  ;;  %v48_v59 = vld [vmem:[%s1188_s0 + $0x20] sm:$0xff]  ;;  %v56_v62 = vpack.c.bf16 %v49_v60, %v49_v60  ;;  %v1007_v0 = vld [vmem:[%s1191_s3 + $0x30] sm:$0xff]  ;;  %v1006_v1 = vld [vmem:[%s1191_s3 + $0x28] sm:$0xff]  ;;  %s696_s0 = sshll.u32 %s1195_s7, 4  ;;  %s697_s0 = int_to_ptr.hbm [resolvable:$true] %s696_s0 }
  0x1a   :  { %501 = vmatpush.bf16.msra.mxu3 %v979_v19  ;;  %v55_v61 = vpack.c.bf16 %v48_v59, %v48_v59  ;;  %v1005_v2 = vld [vmem:[%s1191_s3 + $0x20] sm:$0xff]  ;;  %v1004_v3 = vld [vmem:[%s1191_s3 + $0x18] sm:$0xff]  ;;  %v1003_v4 = vld [vmem:[%s1191_s3 + $0x10] sm:$0xff] }
  0x1b   :  { %463 = vmatpush.bf16.msra.mxu0 %v954_v20  ;;  %v1002_v5 = vld [vmem:[%s1191_s3 + $0x8] sm:$0xff]  ;;  %v1001_v8 = vld [vmem:[%s1191_s3] sm:$0xff]  ;;  %v1012_v11 = vld [vmem:[%s1193_s5 + $0x18] sm:$0xff] }
  0x1c   :  { %476 = vmatpush.bf16.msra.mxu1 %v962_v21  ;;  %v1011_v14 = vld [vmem:[%s1193_s5 + $0x10] sm:$0xff]  ;;  %v1017_v15 = vld [vmem:[%s1190_s2] ss:$0 sm:$0xff]  ;;  %v1010_v16 = vld [vmem:[%s1193_s5 + $0x8] sm:$0xff] }
  0x1d   :  { %489 = vmatpush.bf16.msra.mxu2 %v970_v22  ;;  %v1018_v35 = vld [vmem:[%s1192_s4] ss:$0 sm:$0xff] }
  0x1e   :  { %502 = vmatpush.bf16.msra.mxu3 %v978_v23 }
  0x1f   :  { %464 = vmatpush.bf16.msra.mxu0 %v953_v24 }
  0x20   :  { %477 = vmatpush.bf16.msra.mxu1 %v961_v25 }
  0x21   :  { %490 = vmatpush.bf16.msra.mxu2 %v969_v26 }
  0x22   :  { %503 = vmatpush.bf16.msra.mxu3 %v977_v28 }
  0x23   :  { %465 = vmatpush.bf16.msra.mxu0 %v952_v27 }
  0x24   :  { %478 = vmatpush.bf16.msra.mxu1 %v960_v29 }
  0x25   :  { %491 = vmatpush.bf16.msra.mxu2 %v968_v34  ;;  %v1009_v34 = vld [vmem:[%s1193_s5] sm:$0xff] }
  0x26   :  { %466 = vmatmul.bf16.vlgmr.msra.gmra.mxu0 %v51_v36  ;;  %504 = vmatpush.bf16.msra.mxu3 %v976_v38 }
  0x27   :  { %510 = vmatpush.bf16.msrb.mxu0 %v991_v32  ;;  %479 = vmatmul.bf16.vlgmr.msra.gmra.mxu1 %v52_v37 }
  0x28   :  { %523 = vmatpush.bf16.msrb.mxu1 %v999_v33  ;;  %492 = vmatmul.bf16.vlgmr.msra.gmra.mxu2 %v53_v43 }
  0x29   :  { %543 = vmatpush.bf16.msrb.mxu2 %v1000_v39  ;;  %505 = vmatmul.bf16.vlgmr.msra.gmra.mxu3 %v54_v44 }
  0x2a   :  { %619 = vmatpush.bf16.msrb.mxu3 %v1008_v63 }
  0x2b   :  { %511 = vmatpush.bf16.msrb.mxu0 %v990_v41  ;;  %v1019_v41 = vld [vmem:[%s1194_s6] ss:$0 sm:$0xff] }
  0x2c   :  { %524 = vmatpush.bf16.msrb.mxu1 %v998_v42 }
  0x2d   :  { %678 = vmatpush.bf16.msra.mxu2 %v1012_v11 }
  0x2e   :  { %620 = vmatpush.bf16.msrb.mxu3 %v1007_v0 }
  0x2f   :  { %512 = vmatpush.bf16.msrb.mxu0 %v989_v45 }
  0x30   :  { %525 = vmatpush.bf16.msrb.mxu1 %v997_v46 }
  0x31   :  { %679 = vmatpush.bf16.msra.mxu2 %v1011_v14 }
  0x32   :  { %621 = vmatpush.bf16.msrb.mxu3 %v1006_v1 }
  0x33   :  { %513 = vmatpush.bf16.msrb.mxu0 %v988_v47 }
  0x34   :  { %526 = vmatpush.bf16.msrb.mxu1 %v996_v48 }
  0x35   :  { %680 = vmatpush.bf16.msra.mxu2 %v1010_v16 }
  0x36   :  { %622 = vmatpush.bf16.msrb.mxu3 %v1005_v2 }
  0x37   :  { %514 = vmatpush.bf16.msrb.mxu0 %v987_v49 }
  0x38   :  { %527 = vmatpush.bf16.msrb.mxu1 %v995_v50  ;;  %902 = vmatmul.msk.bf16.vlgmr.msrb.gmra.mxu2 %vm454_vm0, %v57_v54 }
  0x39   :  { %681 = vmatpush.bf16.msra.mxu2 %v1009_v34 }
  0x3a   :  { %623 = vmatpush.bf16.msrb.mxu3 %v1004_v3 }
  0x3b   :  { %515 = vmatpush.bf16.msrb.mxu0 %v986_v52 }
  0x3c   :  { %528 = vmatpush.bf16.msrb.mxu1 %v994_v53 }
  0x3e   :  { %624 = vmatpush.bf16.msrb.mxu3 %v1003_v4 }
  0x3f   :  { %516 = vmatpush.bf16.msrb.mxu0 %v985_v55 }
  0x40   :  { %529 = vmatpush.bf16.msrb.mxu1 %v993_v56 }
  0x42   :  { %625 = vmatpush.bf16.msrb.mxu3 %v1002_v5 }
  0x43   :  { %517 = vmatpush.bf16.msrb.mxu0 %v984_v57 }
  0x44   :  { %530 = vmatpush.bf16.msrb.mxu1 %v992_v58 }
  0x46   :  { %518 = vmatmul.bf16.vlgmr.msrb.gmra.mxu0 %v55_v61  ;;  %626 = vmatpush.bf16.msrb.mxu3 %v1001_v8 }
  0x47   :  { %531 = vmatmul.bf16.vlgmr.msrb.gmra.mxu1 %v56_v62 }
  0xa3   :  { %v467_v6 = vpop.f32.mrf.mxu0 }
  0xa4   :  { %v480_v7 = vpop.f32.mrf.mxu1  ;;  %v468_v17 = vadd.f32 %v1017_v15, %v467_v6 }
  0xa6   :  { %v481_v20 = vadd.f32 %v480_v7, %v468_v17 }
  0xab   :  { %v469_v9 = vpop.f32.mrf.mxu0  ;;  %v493_v12 = vpop.f32.mrf.mxu2 }
  0xac   :  { %v482_v10 = vpop.f32.mrf.mxu1  ;;  %v506_v13 = vpop.f32.mrf.mxu3  ;;  %v494_v21 = vadd.f32 %v493_v12, %v481_v20 }
  0xae   :  { %v507_v23 = vadd.f32 %v506_v13, %v494_v21 }
  0xb3   :  { %v495_v18 = vpop.f32.mrf.mxu2 }
  0xb4   :  { %v508_v19 = vpop.f32.mrf.mxu3 }
  0xbb   :  { %v545_v22 = vpop.f32.mrf.mxu2 }
  0xc3   :  { %v519_v24 = vpop.f32.mrf.mxu0  ;;  %v547_v28 = vpop.f32.mrf.mxu2 }
  0xc4   :  { %v532_v25 = vpop.f32.mrf.mxu1  ;;  %v520_v26 = vadd.f32 %v519_v24, %v507_v23 }
  0xc6   :  { %v533_v27 = vadd.f32 %v532_v25, %v520_v26 }
  0xc8   :  { %v546_v29 = vadd.f32 %v545_v22, %v533_v27 }
  0xca   :  { %v549_v30 = vmax.f32 %v546_v29, 0.0 }
  0xcb   :  { %v521_v31 = vpop.f32.mrf.mxu0 }
  0xcc   :  { %v534_v32 = vpop.f32.mrf.mxu1  ;;  %v550_v33 = vpack.c.bf16 %v549_v30, %v549_v30 }
  0xce   :  { %627 = vmatmul.bf16.vlgmr.msrb.gmra.mxu3 %v550_v33 }
 0x151   :  { %v628_v36 = vpop.f32.mrf.mxu3 }
 0x152   :  { %v629_v37 = vadd.f32 %v1018_v35, %v628_v36 }
 0x154   :  { %v632_v38 = vmax.f32 %v629_v37, 0.0 }
 0x156   :  { %v633_v39 = vpack.c.bf16 %v632_v38, %v632_v38 }
 0x158   :  { %951 = vmatmul.msk.bf16.vlgmr.msra.gmra.mxu2 %vm670_vm1, %v633_v39 }
 0x159   :  { %v630_v40 = vpop.f32.mrf.mxu3 }
 0x1db   :  { %v683_v42 = vpop.f32.mrf.mxu2 }
 0x1dc   :  { %v684_v43 = vadd.f32 %v1019_v41, %v683_v42 }
 0x1de   :  { %688 = vst.msk [vmem:[#allocation5] sm:$0xff] %vm687_vm2, %v684_v43 }
 0x1df   :  { %699 = dma.vmem_to_hbm [thread:$0]  %s695_s25, 128, %s697_s0, [#allocation4]  }
 0x1e3   :  { %v685_v44 = vpop.f32.mrf.mxu2 }
 0x1e4   :  { %1070 = dma.done.wait [#allocation4], 128  }
 0x1e5   :  { %1071 = vsyncadd [#allocation4], 4294967168 }
 0x1e6   :  { %704 = vsyncpa [#allocation3], 1 }
 0x1e7   :  { %705 = vsyncpa [#allocation4], 1 }

</bundles_post_ra>
